<compile_context>
chip_gen: v6e
topology: v6e:2x2x1
jax: 0.10.0
libtpu: 0.0.40
codegen_flags: <defaults>
</compile_context>

<pallas_src>
import functools
import math

import jax
import jax.numpy as jnp
import numpy as np
from jax import lax
from jax.experimental import pallas as pl
from jax.experimental.pallas import tpu as pltpu


def _mha_kernel(q_ref, kv_ref, wq_ref, wkv_ref, woh_ref, bq_ref, bkv_ref, bo_ref,
                bias_ref, out_ref, attn_ref, *, batch, num_heads):
    """Whole multi-head attention forward in one grid step.

    q_ref   : (B*Lq, D)      f32  queries, batch folded into rows
    kv_ref  : (B*Lk, D)      f32  key/value input, batch folded into rows
    wq_ref  : (D, D)         f32  lane-dense query weights (x @ Wq)
    wkv_ref : (D, 2D)        f32  lane-dense [Wk | Wv] weights
    woh_ref : (H, dk, D)     f32  output-projection weights, split per head
    bq_ref  : (1, D)         f32
    bkv_ref : (1, 2D)        f32  [bk | bv]
    bo_ref  : (1, D)         f32
    bias_ref: (B*Lq, B*Lk)   f32  additive score bias: 0 on the per-batch
                                  diagonal blocks, -1e30 elsewhere / on masked keys
    out_ref : (B*Lq, D)      f32  feature output (reshaped to (B, Lq, D) outside)
    attn_ref: (B, H, Lq, Lk) f32  attention probabilities
    """
    B, H = batch, num_heads
    Rq, D = q_ref.shape            # Rq = B * Lq
    Rk = kv_ref.shape[0]           # Rk = B * Lk
    Lq, Lk = Rq // B, Rk // B
    dk = D // H
    f32 = jnp.float32

    # ---- lane-dense projections: 2 MXU pushes (N = D and 2D lanes) --------
    q = jnp.dot(q_ref[...], wq_ref[...], preferred_element_type=f32) + bq_ref[...]
    kv = jnp.dot(kv_ref[...], wkv_ref[...], preferred_element_type=f32) + bkv_ref[...]
    k = kv[:, :D]                  # free-ish lane slices of the fused K|V result
    v = kv[:, D:]

    # ---- head split: cheap lane slices stacked on a new leading major dim --
    def split_heads(x):            # (R, H*dk) -> (H, R, dk)
        return jnp.concatenate(
            [x[:, h * dk:(h + 1) * dk][None] for h in range(H)], axis=0)

    qh, kh, vh = split_heads(q), split_heads(k), split_heads(v)

    # ---- attention for all (batch, head) pairs at once ---------------------
    dn_qk = (((2,), (2,)), ((0,), (0,)))     # contract dk, batch over heads
    scores = lax.dot_general(qh, kh, dn_qk, preferred_element_type=f32)
    scores = scores * (1.0 / math.sqrt(dk)) + bias_ref[...]          # (H, B*Lq, B*Lk)

    # Exact, numerically stable softmax over keys (attn is a user-visible
    # output: rows sum to 1; no approx reciprocal, no bf16 casts).
    m = jnp.max(scores, axis=-1, keepdims=True)
    e = jnp.exp(scores - m)
    p = e / jnp.sum(e, axis=-1, keepdims=True)                        # (H, B*Lq, B*Lk)

    # Attention-probability output: store-only loop over B (all compute above
    # is batched); each iteration is one stacked (H, Lq, Lk) slab store.
    for b in range(B):
        attn_ref[b] = p[:, b * Lq:(b + 1) * Lq,
                        b * Lk:(b + 1) * Lk].astype(attn_ref.dtype)

    # TODO(synk): training-mode dropout (p=0.1) on the attention probabilities
    # is the eval-mode identity and is not implemented.

    dn_pv = (((2,), (1,)), ((0,), (0,)))     # contract keys, batch over heads
    ctx = lax.dot_general(p, vh, dn_pv, preferred_element_type=f32)   # (H, B*Lq, dk)

    # ---- output projection: ONE head-batched matmul + sum over heads -------
    dn_out = (((2,), (1,)), ((0,), (0,)))    # contract dk, batch over heads
    per_head = lax.dot_general(ctx, woh_ref[...], dn_out,
                               preferred_element_type=f32)            # (H, B*Lq, D)
    feat = bo_ref[...]
    for h in range(H):             # H vector adds on the batched result
        feat = feat + per_head[h]  # (no serial MXU dependency, unlike the old loop)
    out_ref[...] = feat.astype(out_ref.dtype)


def self_attention_feature_extract(inputs, query, params, *, num_heads, mask=None):
    """inputs: (B, Lk, D) -> key & value ; query: (B, Lq, D). Returns (feature, attn).

    Optional `mask` of shape (B, Lk): zero entries are masked out of the
    attention (matches the module's masked_fill(mask == 0, -inf)).
    """
    B, Lk, D = inputs.shape
    Bq, Lq, Dq = query.shape
    assert B == Bq and D == Dq and D % num_heads == 0
    H = num_heads
    dk = D // H
    f32 = jnp.float32

    # --- wrapper-side (free) weight packing: lane-dense projections --------
    # PyTorch Linear: y = x @ W.T + b with W: (D_out, D_in).
    wq = params["wq"].T.astype(f32)                                        # (D, D)
    wkv = jnp.concatenate([params["wk"].T, params["wv"].T], axis=1).astype(f32)  # (D, 2D)
    # Output projection kept per-head (H, dk, D): consumed by one head-batched
    # dot_general + head-sum inside the kernel (no per-head Q/K/V weights).
    woh = jnp.reshape(params["wo"].T, (H, dk, D)).astype(f32)
    bq = jnp.reshape(params["bq"], (1, D)).astype(f32)
    bkv = jnp.concatenate([params["bk"], params["bv"]]).reshape(1, 2 * D).astype(f32)
    bo = jnp.reshape(params["bo"], (1, D)).astype(f32)

    # Fold batch into rows for the projection matmuls (bigger MXU M).
    q2 = query.reshape(B * Lq, D).astype(f32)
    kv2 = inputs.reshape(B * Lk, D).astype(f32)

    # Block-diagonal additive score bias: lets the kernel batch the attention
    # over heads only (one softmax / one PV for the whole batch) while keeping
    # batches independent; the optional attention mask folds into the same slot.
    rb = jnp.arange(B * Lq)[:, None] // Lq
    cb = jnp.arange(B * Lk)[None, :] // Lk
    bias = jnp.where(rb == cb, 0.0, -1e30).astype(f32)                     # (B*Lq, B*Lk)
    if mask is not None:
        keep = (mask.reshape(B * Lk) != 0)
        bias = bias + jnp.where(keep, 0.0, -1e30)[None, :].astype(f32)

    kernel = functools.partial(_mha_kernel, batch=B, num_heads=H)

    feat2, attn = pl.pallas_call(
        kernel,
        out_shape=(
            jax.ShapeDtypeStruct((B * Lq, D), f32),
            # TODO(synk): emit bf16 attn if downstream tolerates it (halves writeback).
            jax.ShapeDtypeStruct((B, H, Lq, Lk), f32),
        ),
        grid_spec=pltpu.PrefetchScalarGridSpec(
            num_scalar_prefetch=0,
            # Single grid step: at B=2, L=8 the ~0.35 us/step pipeline overhead
            # never amortizes.  For larger B/L add a leading "parallel" batch
            # axis (v7x 2-TC sharding) and a kv-tile axis with online softmax.
            grid=(1,),
            in_specs=[
                pl.BlockSpec((B * Lq, D), lambda i: (0, 0)),          # queries
                pl.BlockSpec((B * Lk, D), lambda i: (0, 0)),          # key/value input
                pl.BlockSpec((D, D), lambda i: (0, 0)),               # Wq
                pl.BlockSpec((D, 2 * D), lambda i: (0, 0)),           # [Wk | Wv]
                pl.BlockSpec((H, dk, D), lambda i: (0, 0, 0)),        # Wo per head
                pl.BlockSpec((1, D), lambda i: (0, 0)),               # bq
                pl.BlockSpec((1, 2 * D), lambda i: (0, 0)),           # [bk | bv]
                pl.BlockSpec((1, D), lambda i: (0, 0)),               # bo
                pl.BlockSpec((B * Lq, B * Lk), lambda i: (0, 0)),     # score bias
            ],
            out_specs=[
                pl.BlockSpec((B * Lq, D), lambda i: (0, 0)),
                pl.BlockSpec((B, H, Lq, Lk), lambda i: (0, 0, 0, 0)),
            ],
        ),
        compiler_params=pltpu.CompilerParams(
            dimension_semantics=("arbitrary",)),
    )(q2, kv2, wq, wkv, woh, bq, bkv, bo, bias)
    return feat2.reshape(B, Lq, D), attn


def _reference(inputs, query, params, *, num_heads):
    """Pure-JAX f32 reference matching the PyTorch forward (eval mode, no mask)."""
    B, Lq, D = query.shape
    Lk = inputs.shape[1]
    d_k = D // num_heads

    def lin(x, w, b):
        return x @ w.T + b

    Q = lin(query, params["wq"], params["bq"]).reshape(B, Lq, num_heads, d_k).transpose(0, 2, 1, 3)
    K = lin(inputs, params["wk"], params["bk"]).reshape(B, Lk, num_heads, d_k).transpose(0, 2, 1, 3)
    V = lin(inputs, params["wv"], params["bv"]).reshape(B, Lk, num_heads, d_k).transpose(0, 2, 1, 3)

    scores = jnp.einsum("bhqd,bhkd->bhqk", Q, K) / math.sqrt(d_k)
    p = jax.nn.softmax(scores, axis=-1)
    x = jnp.einsum("bhqk,bhkd->bhqd", p, V)
    x = x.transpose(0, 2, 1, 3).reshape(B, Lq, D)
    feat = lin(x, params["wo"], params["bo"])
    return feat, p


if __name__ == "__main__":
    # Shapes consistent with the module: multi_head_num=4, input_size (d_model)=32.
    B, Lq, Lk, D, H = 2, 8, 8, 32, 4

    key = jax.random.PRNGKey(0)
    ks = jax.random.split(key, 10)

    scale = 1.0 / math.sqrt(D)
    params = {
        "wq": jax.random.normal(ks[0], (D, D), jnp.float32) * scale,
        "bq": jax.random.normal(ks[1], (D,), jnp.float32) * scale,
        "wk": jax.random.normal(ks[2], (D, D), jnp.float32) * scale,
        "bk": jax.random.normal(ks[3], (D,), jnp.float32) * scale,
        "wv": jax.random.normal(ks[4], (D, D), jnp.float32) * scale,
        "bv": jax.random.normal(ks[5], (D,), jnp.float32) * scale,
        "wo": jax.random.normal(ks[6], (D, D), jnp.float32) * scale,
        "bo": jax.random.normal(ks[7], (D,), jnp.float32) * scale,
    }

    inputs = jax.random.normal(ks[8], (B, Lk, D), jnp.float32)   # key & value
    query = jax.random.normal(ks[9], (B, Lq, D), jnp.float32)

    feature, attn = self_attention_feature_extract(inputs, query, params, num_heads=H)
    jax.block_until_ready((feature, attn))

    ref_feat, ref_attn = _reference(inputs, query, params, num_heads=H)

    # Exact softmax normalization (correctness-review item): rows sum to 1.
    row_sums = np.asarray(jnp.sum(attn, axis=-1))
    np.testing.assert_allclose(row_sums, np.ones_like(row_sums), atol=1e-4)

    # Tolerances absorb MXU-vs-XLA f32 matmul rounding only; any structural bug
    # (head/batch mapping, weight layout, softmax axis, mask placement) shows up
    # as O(0.1+) deviations and is still caught.
    np.testing.assert_allclose(np.asarray(attn), np.asarray(ref_attn), rtol=2e-2, atol=5e-3)
    np.testing.assert_allclose(np.asarray(feature), np.asarray(ref_feat), rtol=2e-2, atol=1e-2)

    print("KERNEL_OK")
</pallas_src>

<mosaic_0001>
module attributes {stable_mosaic.version = 11 : i64} {
  func.func @_mha_kernel(%arg0: i32, %arg1: memref<16x32xf32, #tpu.memory_space<vmem>>, %arg2: memref<16x32xf32, #tpu.memory_space<vmem>>, %arg3: memref<32x32xf32, #tpu.memory_space<vmem>>, %arg4: memref<32x64xf32, #tpu.memory_space<vmem>>, %arg5: memref<4x8x32xf32, #tpu.memory_space<vmem>>, %arg6: memref<1x32xf32, #tpu.memory_space<vmem>>, %arg7: memref<1x64xf32, #tpu.memory_space<vmem>>, %arg8: memref<1x32xf32, #tpu.memory_space<vmem>>, %arg9: memref<16x16xf32, #tpu.memory_space<vmem>>, %arg10: memref<16x32xf32, #tpu.memory_space<vmem>>, %arg11: memref<2x4x8x8xf32, #tpu.memory_space<vmem>>) attributes {dimension_semantics = [#tpu.dimension_semantics<arbitrary>], iteration_bounds = array<i64: 1>, scalar_prefetch = 0 : i64, scratch_operands = 0 : i64, tpu.core_type = #tpu.core_type<tc>, window_params = [{pipeline_mode = #tpu.pipeline_mode<synchronous>, transform_indices = @transform_0, window_bounds = array<i64: 16, 32>}, {pipeline_mode = #tpu.pipeline_mode<synchronous>, transform_indices = @transform_1, window_bounds = array<i64: 16, 32>}, {pipeline_mode = #tpu.pipeline_mode<synchronous>, transform_indices = @transform_2, window_bounds = array<i64: 32, 32>}, {pipeline_mode = #tpu.pipeline_mode<synchronous>, transform_indices = @transform_3, window_bounds = array<i64: 32, 64>}, {pipeline_mode = #tpu.pipeline_mode<synchronous>, transform_indices = @transform_4, window_bounds = array<i64: 4, 8, 32>}, {pipeline_mode = #tpu.pipeline_mode<synchronous>, transform_indices = @transform_5, window_bounds = array<i64: 1, 32>}, {pipeline_mode = #tpu.pipeline_mode<synchronous>, transform_indices = @transform_6, window_bounds = array<i64: 1, 64>}, {pipeline_mode = #tpu.pipeline_mode<synchronous>, transform_indices = @transform_7, window_bounds = array<i64: 1, 32>}, {pipeline_mode = #tpu.pipeline_mode<synchronous>, transform_indices = @transform_8, window_bounds = array<i64: 16, 16>}, {pipeline_mode = #tpu.pipeline_mode<synchronous>, transform_indices = @transform_9, window_bounds = array<i64: 16, 32>}, {pipeline_mode = #tpu.pipeline_mode<synchronous>, transform_indices = @transform_10, window_bounds = array<i64: 2, 4, 8, 8>}]} {
    %c0 = arith.constant 0 : index
    %c0_0 = arith.constant 0 : index
    %0 = vector.load %arg1[%c0, %c0_0] : memref<16x32xf32, #tpu.memory_space<vmem>>, vector<16x32xf32>
    %c0_1 = arith.constant 0 : index
    %c0_2 = arith.constant 0 : index
    %1 = vector.load %arg3[%c0_1, %c0_2] : memref<32x32xf32, #tpu.memory_space<vmem>>, vector<32x32xf32>
    %cst = arith.constant dense<0.000000e+00> : vector<16x32xf32>
    %2 = tpu.matmul %0, %1, %cst {dimension_numbers = #tpu.dot_dimension_numbers<[1], [0], [0], [1], [0, 0, 1, 1], [], []>} : vector<16x32xf32>, vector<32x32xf32>, vector<16x32xf32> -> vector<16x32xf32>
    %c0_3 = arith.constant 0 : index
    %c0_4 = arith.constant 0 : index
    %3 = vector.load %arg6[%c0_3, %c0_4] : memref<1x32xf32, #tpu.memory_space<vmem>>, vector<1x32xf32>
    %4 = vector.broadcast %3 : vector<1x32xf32> to vector<16x32xf32>
    %5 = arith.addf %2, %4 : vector<16x32xf32>
    %c0_5 = arith.constant 0 : index
    %c0_6 = arith.constant 0 : index
    %6 = vector.load %arg2[%c0_5, %c0_6] : memref<16x32xf32, #tpu.memory_space<vmem>>, vector<16x32xf32>
    %c0_7 = arith.constant 0 : index
    %c0_8 = arith.constant 0 : index
    %7 = vector.load %arg4[%c0_7, %c0_8] : memref<32x64xf32, #tpu.memory_space<vmem>>, vector<32x64xf32>
    %cst_9 = arith.constant dense<0.000000e+00> : vector<16x64xf32>
    %8 = tpu.matmul %6, %7, %cst_9 {dimension_numbers = #tpu.dot_dimension_numbers<[1], [0], [0], [1], [0, 0, 1, 1], [], []>} : vector<16x32xf32>, vector<32x64xf32>, vector<16x64xf32> -> vector<16x64xf32>
    %c0_10 = arith.constant 0 : index
    %c0_11 = arith.constant 0 : index
    %9 = vector.load %arg7[%c0_10, %c0_11] : memref<1x64xf32, #tpu.memory_space<vmem>>, vector<1x64xf32>
    %10 = vector.broadcast %9 : vector<1x64xf32> to vector<16x64xf32>
    %11 = arith.addf %8, %10 : vector<16x64xf32>
    %12 = vector.extract_strided_slice %11 {offsets = [0, 0], sizes = [16, 32], strides = [1, 1]} : vector<16x64xf32> to vector<16x32xf32>
    %13 = vector.extract_strided_slice %11 {offsets = [0, 32], sizes = [16, 32], strides = [1, 1]} : vector<16x64xf32> to vector<16x32xf32>
    %14 = vector.extract_strided_slice %5 {offsets = [0, 0], sizes = [16, 8], strides = [1, 1]} : vector<16x32xf32> to vector<16x8xf32>
    %15 = vector.shape_cast %14 : vector<16x8xf32> to vector<1x16x8xf32>
    %16 = vector.extract_strided_slice %5 {offsets = [0, 8], sizes = [16, 8], strides = [1, 1]} : vector<16x32xf32> to vector<16x8xf32>
    %17 = vector.shape_cast %16 : vector<16x8xf32> to vector<1x16x8xf32>
    %18 = vector.extract_strided_slice %5 {offsets = [0, 16], sizes = [16, 8], strides = [1, 1]} : vector<16x32xf32> to vector<16x8xf32>
    %19 = vector.shape_cast %18 : vector<16x8xf32> to vector<1x16x8xf32>
    %20 = vector.extract_strided_slice %5 {offsets = [0, 24], sizes = [16, 8], strides = [1, 1]} : vector<16x32xf32> to vector<16x8xf32>
    %21 = vector.shape_cast %20 : vector<16x8xf32> to vector<1x16x8xf32>
    %22 = tpu.concatenate %15, %17, %19, %21 in 0 : vector<1x16x8xf32>, vector<1x16x8xf32>, vector<1x16x8xf32>, vector<1x16x8xf32> -> vector<4x16x8xf32>
    %23 = vector.extract_strided_slice %12 {offsets = [0, 0], sizes = [16, 8], strides = [1, 1]} : vector<16x32xf32> to vector<16x8xf32>
    %24 = vector.shape_cast %23 : vector<16x8xf32> to vector<1x16x8xf32>
    %25 = vector.extract_strided_slice %12 {offsets = [0, 8], sizes = [16, 8], strides = [1, 1]} : vector<16x32xf32> to vector<16x8xf32>
    %26 = vector.shape_cast %25 : vector<16x8xf32> to vector<1x16x8xf32>
    %27 = vector.extract_strided_slice %12 {offsets = [0, 16], sizes = [16, 8], strides = [1, 1]} : vector<16x32xf32> to vector<16x8xf32>
    %28 = vector.shape_cast %27 : vector<16x8xf32> to vector<1x16x8xf32>
    %29 = vector.extract_strided_slice %12 {offsets = [0, 24], sizes = [16, 8], strides = [1, 1]} : vector<16x32xf32> to vector<16x8xf32>
    %30 = vector.shape_cast %29 : vector<16x8xf32> to vector<1x16x8xf32>
    %31 = tpu.concatenate %24, %26, %28, %30 in 0 : vector<1x16x8xf32>, vector<1x16x8xf32>, vector<1x16x8xf32>, vector<1x16x8xf32> -> vector<4x16x8xf32>
    %32 = vector.extract_strided_slice %13 {offsets = [0, 0], sizes = [16, 8], strides = [1, 1]} : vector<16x32xf32> to vector<16x8xf32>
    %33 = vector.shape_cast %32 : vector<16x8xf32> to vector<1x16x8xf32>
    %34 = vector.extract_strided_slice %13 {offsets = [0, 8], sizes = [16, 8], strides = [1, 1]} : vector<16x32xf32> to vector<16x8xf32>
    %35 = vector.shape_cast %34 : vector<16x8xf32> to vector<1x16x8xf32>
    %36 = vector.extract_strided_slice %13 {offsets = [0, 16], sizes = [16, 8], strides = [1, 1]} : vector<16x32xf32> to vector<16x8xf32>
    %37 = vector.shape_cast %36 : vector<16x8xf32> to vector<1x16x8xf32>
    %38 = vector.extract_strided_slice %13 {offsets = [0, 24], sizes = [16, 8], strides = [1, 1]} : vector<16x32xf32> to vector<16x8xf32>
    %39 = vector.shape_cast %38 : vector<16x8xf32> to vector<1x16x8xf32>
    %40 = tpu.concatenate %33, %35, %37, %39 in 0 : vector<1x16x8xf32>, vector<1x16x8xf32>, vector<1x16x8xf32>, vector<1x16x8xf32> -> vector<4x16x8xf32>
    %cst_12 = arith.constant dense<0.000000e+00> : vector<4x16x16xf32>
    %41 = tpu.matmul %22, %31, %cst_12 {dimension_numbers = #tpu.dot_dimension_numbers<[2], [2], [1], [1], [0, 0, 0, 1, 1, 1], [0], [0]>} : vector<4x16x8xf32>, vector<4x16x8xf32>, vector<4x16x16xf32> -> vector<4x16x16xf32>
    %cst_13 = arith.constant 0.353553385 : f32
    %42 = vector.broadcast %cst_13 : f32 to vector<4x16x16xf32>
    %43 = arith.mulf %41, %42 : vector<4x16x16xf32>
    %c0_14 = arith.constant 0 : index
    %c0_15 = arith.constant 0 : index
    %44 = vector.load %arg9[%c0_14, %c0_15] : memref<16x16xf32, #tpu.memory_space<vmem>>, vector<16x16xf32>
    %45 = vector.shape_cast %44 : vector<16x16xf32> to vector<1x16x16xf32>
    %46 = vector.broadcast %45 : vector<1x16x16xf32> to vector<4x16x16xf32>
    %47 = arith.addf %43, %46 : vector<4x16x16xf32>
    %cst_16 = arith.constant dense<0xFF800000> : vector<4x16xf32>
    %48 = vector.multi_reduction <maximumf>, %47, %cst_16 [2] : vector<4x16x16xf32> to vector<4x16xf32>
    %49 = vector.shape_cast %48 : vector<4x16xf32> to vector<4x16x1xf32>
    %50 = vector.broadcast %49 : vector<4x16x1xf32> to vector<4x16x16xf32>
    %51 = arith.subf %47, %50 : vector<4x16x16xf32>
    %52 = math.exp %51 : vector<4x16x16xf32>
    %cst_17 = arith.constant dense<0.000000e+00> : vector<4x16xf32>
    %53 = vector.multi_reduction <add>, %52, %cst_17 [2] : vector<4x16x16xf32> to vector<4x16xf32>
    %54 = vector.shape_cast %53 : vector<4x16xf32> to vector<4x16x1xf32>
    %55 = vector.broadcast %54 : vector<4x16x1xf32> to vector<4x16x16xf32>
    %56 = arith.divf %52, %55 : vector<4x16x16xf32>
    %57 = vector.extract_strided_slice %56 {offsets = [0, 0, 0], sizes = [4, 8, 8], strides = [1, 1, 1]} : vector<4x16x16xf32> to vector<4x8x8xf32>
    %c0_18 = arith.constant 0 : index
    %c0_19 = arith.constant 0 : index
    %c0_20 = arith.constant 0 : index
    %c0_21 = arith.constant 0 : index
    %58 = vector.load %arg11[%c0_18, %c0_19, %c0_20, %c0_21] : memref<2x4x8x8xf32, #tpu.memory_space<vmem>>, vector<1x4x8x8xf32>
    %59 = vector.shape_cast %58 : vector<1x4x8x8xf32> to vector<4x8x8xf32>
    %60 = vector.shape_cast %57 : vector<4x8x8xf32> to vector<1x4x8x8xf32>
    tpu.vector_store %arg11[%c0_18, %c0_19, %c0_20, %c0_21], %60 {strides = array<i32>} : memref<2x4x8x8xf32, #tpu.memory_space<vmem>>, vector<1x4x8x8xf32>,
    %61 = vector.extract_strided_slice %56 {offsets = [0, 8, 8], sizes = [4, 8, 8], strides = [1, 1, 1]} : vector<4x16x16xf32> to vector<4x8x8xf32>
    %c1 = arith.constant 1 : index
    %c0_22 = arith.constant 0 : index
    %c0_23 = arith.constant 0 : index
    %c0_24 = arith.constant 0 : index
    %62 = vector.load %arg11[%c1, %c0_22, %c0_23, %c0_24] : memref<2x4x8x8xf32, #tpu.memory_space<vmem>>, vector<1x4x8x8xf32>
    %63 = vector.shape_cast %62 : vector<1x4x8x8xf32> to vector<4x8x8xf32>
    %64 = vector.shape_cast %61 : vector<4x8x8xf32> to vector<1x4x8x8xf32>
    tpu.vector_store %arg11[%c1, %c0_22, %c0_23, %c0_24], %64 {strides = array<i32>} : memref<2x4x8x8xf32, #tpu.memory_space<vmem>>, vector<1x4x8x8xf32>,
    %cst_25 = arith.constant dense<0.000000e+00> : vector<4x16x8xf32>
    %65 = tpu.matmul %56, %40, %cst_25 {dimension_numbers = #tpu.dot_dimension_numbers<[2], [1], [1], [2], [0, 0, 0, 1, 1, 2], [0], [0]>} : vector<4x16x16xf32>, vector<4x16x8xf32>, vector<4x16x8xf32> -> vector<4x16x8xf32>
    %c0_26 = arith.constant 0 : index
    %c0_27 = arith.constant 0 : index
    %c0_28 = arith.constant 0 : index
    %66 = vector.load %arg5[%c0_26, %c0_27, %c0_28] : memref<4x8x32xf32, #tpu.memory_space<vmem>>, vector<4x8x32xf32>
    %cst_29 = arith.constant dense<0.000000e+00> : vector<4x16x32xf32>
    %67 = tpu.matmul %65, %66, %cst_29 {dimension_numbers = #tpu.dot_dimension_numbers<[2], [1], [1], [2], [0, 0, 0, 1, 1, 2], [0], [0]>} : vector<4x16x8xf32>, vector<4x8x32xf32>, vector<4x16x32xf32> -> vector<4x16x32xf32>
    %c0_30 = arith.constant 0 : index
    %c0_31 = arith.constant 0 : index
    %68 = vector.load %arg8[%c0_30, %c0_31] : memref<1x32xf32, #tpu.memory_space<vmem>>, vector<1x32xf32>
    %69 = vector.extract_strided_slice %67 {offsets = [0, 0, 0], sizes = [1, 16, 32], strides = [1, 1, 1]} : vector<4x16x32xf32> to vector<1x16x32xf32>
    %70 = vector.shape_cast %69 : vector<1x16x32xf32> to vector<16x32xf32>
    %71 = vector.broadcast %68 : vector<1x32xf32> to vector<16x32xf32>
    %72 = arith.addf %71, %70 : vector<16x32xf32>
    %73 = vector.extract_strided_slice %67 {offsets = [1, 0, 0], sizes = [1, 16, 32], strides = [1, 1, 1]} : vector<4x16x32xf32> to vector<1x16x32xf32>
    %74 = vector.shape_cast %73 : vector<1x16x32xf32> to vector<16x32xf32>
    %75 = arith.addf %72, %74 : vector<16x32xf32>
    %76 = vector.extract_strided_slice %67 {offsets = [2, 0, 0], sizes = [1, 16, 32], strides = [1, 1, 1]} : vector<4x16x32xf32> to vector<1x16x32xf32>
    %77 = vector.shape_cast %76 : vector<1x16x32xf32> to vector<16x32xf32>
    %78 = arith.addf %75, %77 : vector<16x32xf32>
    %79 = vector.extract_strided_slice %67 {offsets = [3, 0, 0], sizes = [1, 16, 32], strides = [1, 1, 1]} : vector<4x16x32xf32> to vector<1x16x32xf32>
    %80 = vector.shape_cast %79 : vector<1x16x32xf32> to vector<16x32xf32>
    %81 = arith.addf %78, %80 : vector<16x32xf32>
    %c0_32 = arith.constant 0 : index
    %c0_33 = arith.constant 0 : index
    %82 = vector.load %arg10[%c0_32, %c0_33] : memref<16x32xf32, #tpu.memory_space<vmem>>, vector<16x32xf32>
    tpu.vector_store %arg10[%c0_32, %c0_33], %81 {strides = array<i32>} : memref<16x32xf32, #tpu.memory_space<vmem>>, vector<16x32xf32>,
    return
  }
  func.func @transform_0(%arg0: i32) -> (i32, i32) {
    %c0_i32 = arith.constant 0 : i32
    %c0_i32_0 = arith.constant 0 : i32
    %c0_i32_1 = arith.constant 0 : i32
    return %c0_i32, %c0_i32_0 : i32, i32
  }
  func.func @transform_1(%arg0: i32) -> (i32, i32) {
    %c0_i32 = arith.constant 0 : i32
    %c0_i32_0 = arith.constant 0 : i32
    %c0_i32_1 = arith.constant 0 : i32
    return %c0_i32, %c0_i32_0 : i32, i32
  }
  func.func @transform_2(%arg0: i32) -> (i32, i32) {
    %c0_i32 = arith.constant 0 : i32
    %c0_i32_0 = arith.constant 0 : i32
    %c0_i32_1 = arith.constant 0 : i32
    return %c0_i32, %c0_i32_0 : i32, i32
  }
  func.func @transform_3(%arg0: i32) -> (i32, i32) {
    %c0_i32 = arith.constant 0 : i32
    %c0_i32_0 = arith.constant 0 : i32
    %c0_i32_1 = arith.constant 0 : i32
    return %c0_i32, %c0_i32_0 : i32, i32
  }
  func.func @transform_4(%arg0: i32) -> (i32, i32, i32) {
    %c0_i32 = arith.constant 0 : i32
    %c0_i32_0 = arith.constant 0 : i32
    %c0_i32_1 = arith.constant 0 : i32
    %c0_i32_2 = arith.constant 0 : i32
    return %c0_i32, %c0_i32_0, %c0_i32_1 : i32, i32, i32
  }
  func.func @transform_5(%arg0: i32) -> (i32, i32) {
    %c0_i32 = arith.constant 0 : i32
    %c0_i32_0 = arith.constant 0 : i32
    %c0_i32_1 = arith.constant 0 : i32
    return %c0_i32, %c0_i32_0 : i32, i32
  }
  func.func @transform_6(%arg0: i32) -> (i32, i32) {
    %c0_i32 = arith.constant 0 : i32
    %c0_i32_0 = arith.constant 0 : i32
    %c0_i32_1 = arith.constant 0 : i32
    return %c0_i32, %c0_i32_0 : i32, i32
  }
  func.func @transform_7(%arg0: i32) -> (i32, i32) {
    %c0_i32 = arith.constant 0 : i32
    %c0_i32_0 = arith.constant 0 : i32
    %c0_i32_1 = arith.constant 0 : i32
    return %c0_i32, %c0_i32_0 : i32, i32
  }
  func.func @transform_8(%arg0: i32) -> (i32, i32) {
    %c0_i32 = arith.constant 0 : i32
    %c0_i32_0 = arith.constant 0 : i32
    %c0_i32_1 = arith.constant 0 : i32
    return %c0_i32, %c0_i32_0 : i32, i32
  }
  func.func @transform_9(%arg0: i32) -> (i32, i32) {
    %c0_i32 = arith.constant 0 : i32
    %c0_i32_0 = arith.constant 0 : i32
    %c0_i32_1 = arith.constant 0 : i32
    return %c0_i32, %c0_i32_0 : i32, i32
  }
  func.func @transform_10(%arg0: i32) -> (i32, i32, i32, i32) {
    %c0_i32 = arith.constant 0 : i32
    %c0_i32_0 = arith.constant 0 : i32
    %c0_i32_1 = arith.constant 0 : i32
    %c0_i32_2 = arith.constant 0 : i32
    %c0_i32_3 = arith.constant 0 : i32
    return %c0_i32, %c0_i32_0, %c0_i32_1, %c0_i32_2 : i32, i32, i32, i32
  }
}

</mosaic_0001>

<bundles_post_ra>
// kernel: tpu_custom_call.1
= control target key start
LH: loop header
LB: loop body
LE: loop exit
PB: predicated region body
PF: predicated region fallthrough
CT: control target
= control target key end

     0   :  { %16 = vsyncpa [#allocation3], 0  ;;  %s2206_s0 = inlined_call_operand.hbm [shape: f32[16,32], index: 0, kind: input, shape index: {}]   ;;  %s2207_s1 = inlined_call_operand.hbm [shape: f32[16,32], index: 1, kind: input, shape index: {}]   ;;  %s2208_s2 = inlined_call_operand.hbm [shape: f32[32,32], index: 2, kind: input, shape index: {}]   ;;  %s2209_s3 = inlined_call_operand.hbm [shape: f32[32,64], index: 3, kind: input, shape index: {}]   ;;  %s2210_s4 = inlined_call_operand.hbm [shape: f32[4,8,32], index: 4, kind: input, shape index: {}]   ;;  %s2211_s5 = inlined_call_operand.vmem [shape: f32[1,32], index: 5, kind: input, shape index: {}]   ;;  %s2212_s6 = inlined_call_operand.vmem [shape: f32[1,64], index: 6, kind: input, shape index: {}]   ;;  %s2213_s7 = inlined_call_operand.vmem [shape: f32[1,32], index: 7, kind: input, shape index: {}]   ;;  %s2214_s8 = inlined_call_operand.hbm [shape: f32[16,16], index: 8, kind: input, shape index: {}]   ;;  %s2215_s9 = inlined_call_operand.hbm [shape: f32[16,32], index: 9, kind: output, shape index: {0}]   ;;  %s2216_s10 = inlined_call_operand.hbm [shape: f32[2,4,8,8], index: 10, kind: output, shape index: {1}]  }
   0x1   :  { %17 = vsyncpa [#allocation6], 0 }
   0x2   :  { %18 = vsyncpa [#allocation9], 0 }
   0x3   :  { %19 = vsyncpa [#allocation12], 0 }
   0x4   :  { %20 = vsyncpa [#allocation4], 0 }
   0x5   :  { %21 = vsyncpa [#allocation15], 0  ;;  %s1936_s13 = smov [#allocation5]   ;;  %s1937_s15 = smov [#allocation8]  }
   0x6   :  { %s39_s14 = sshll.u32 %s1936_s13, 4  ;;  %s63_s16 = sshll.u32 %s1937_s15, 4  ;;  %s40_s14 = int_to_ptr.vmem [resolvable:$true] %s39_s14  ;;  %s64_s16 = int_to_ptr.vmem [resolvable:$true] %s63_s16 }
   0x7   :  { %s1772_s17 = scalar_lea.vmem %s40_s14, 256  ;;  %p1777_p1 = scmp.lt.s32.totalorder %s40_s14, %s40_s14 }
   0x8   :  { %p1773_p0 = scmp.ne.s32.totalorder %s40_s14, %s1772_s17  ;;  %p1778_p2 = scmp.lt.s32.totalorder %s1772_s17, %s1772_s17 }
   0xa   :  { %p1779_p3 = por %p1778_p2, %p1777_p1 }
   0xc   :  { %p1780_p4 = pnand %p1779_p3, %p1773_p0 }
   0xe   :  { %1783 = shalt.err (!%p1780_p4)
}
   0xf   :  { %s1938_s18 = smov 128   ;;  %s1939_s19 = smov 8  }
  0x10   :  { %45 = dma.hbm_to_vmem [thread:$0]  %s2207_s1, 256, %s40_s14, [#allocation6], %s1938_s18, %s1938_s18, %s1939_s19  }
  0x11   :  { %s1792_s22 = scalar_lea.vmem %s64_s16, 512  ;;  %p1797_p6 = scmp.lt.s32.totalorder %s64_s16, %s64_s16 }
  0x12   :  { %p1793_p5 = scmp.ne.s32.totalorder %s64_s16, %s1792_s22  ;;  %p1798_p7 = scmp.lt.s32.totalorder %s1792_s22, %s1792_s22 }
  0x14   :  { %p1799_p8 = por %p1798_p7, %p1797_p6 }
  0x16   :  { %p1800_p9 = pnand %p1799_p8, %p1793_p5 }
  0x18   :  { %1803 = shalt.err (!%p1800_p9)
}
  0x19   :  { %69 = dma.hbm_to_vmem [thread:$0]  %s2209_s3, 512, %s64_s16, [#allocation9], %s1938_s18, %s1938_s18, %s1939_s19  }
  0x1a   :  { %s1940_s25 = smov [#allocation2]   ;;  %s1941_s27 = smov [#allocation7]  }
  0x1b   :  { %s27_s26 = sshll.u32 %s1940_s25, 4  ;;  %s51_s28 = sshll.u32 %s1941_s27, 4  ;;  %s28_s26 = int_to_ptr.vmem [resolvable:$true] %s27_s26  ;;  %s52_s28 = int_to_ptr.vmem [resolvable:$true] %s51_s28 }
  0x1c   :  { %s1812_s1 = scalar_lea.vmem %s28_s26, 256  ;;  %p1817_p11 = scmp.lt.s32.totalorder %s28_s26, %s28_s26 }
  0x1d   :  { %p1813_p10 = scmp.ne.s32.totalorder %s28_s26, %s1812_s1  ;;  %p1818_p12 = scmp.lt.s32.totalorder %s1812_s1, %s1812_s1 }
  0x1f   :  { %p1819_p13 = por %p1818_p12, %p1817_p11 }
  0x21   :  { %p1820_p0 = pnand %p1819_p13, %p1813_p10 }
  0x23   :  { %1823 = shalt.err (!%p1820_p0)
}
  0x24   :  { %33 = dma.hbm_to_vmem [thread:$0]  %s2206_s0, 256, %s28_s26, [#allocation3], %s1938_s18, %s1938_s18, %s1939_s19  }
  0x25   :  { %s1832_s3 = scalar_lea.vmem %s52_s28, 512  ;;  %p1837_p2 = scmp.lt.s32.totalorder %s52_s28, %s52_s28 }
  0x26   :  { %p1833_p1 = scmp.ne.s32.totalorder %s52_s28, %s1832_s3  ;;  %p1838_p3 = scmp.lt.s32.totalorder %s1832_s3, %s1832_s3 }
  0x28   :  { %p1839_p4 = por %p1838_p3, %p1837_p2 }
  0x2a   :  { %p1840_p5 = pnand %p1839_p4, %p1833_p1 }
  0x2c   :  { %1843 = shalt.err (!%p1840_p5)
}
  0x2d   :  { %57 = dma.hbm_to_vmem [thread:$0]  %s2208_s2, 512, %s52_s28, [#allocation6], %s1938_s18, %s1938_s18, %s1939_s19  }
  0x2e   :  { %s1942_s13 = smov [#allocation10]   ;;  %s1943_s15 = smov [#allocation11]  }
  0x2f   :  { %s75_s14 = sshll.u32 %s1942_s13, 4  ;;  %s93_s16 = sshll.u32 %s1943_s15, 4  ;;  %s76_s14 = int_to_ptr.vmem [resolvable:$true] %s75_s14  ;;  %s94_s16 = int_to_ptr.vmem [resolvable:$true] %s93_s16 }
  0x30   :  { %s1852_s0 = scalar_lea.vmem %s76_s14, 512  ;;  %p1857_p7 = scmp.lt.s32.totalorder %s76_s14, %s76_s14 }
  0x31   :  { %p1853_p6 = scmp.ne.s32.totalorder %s76_s14, %s1852_s0  ;;  %p1858_p8 = scmp.lt.s32.totalorder %s1852_s0, %s1852_s0 }
  0x33   :  { %p1859_p9 = por %p1858_p8, %p1857_p7 }
  0x35   :  { %p1860_p10 = pnand %p1859_p9, %p1853_p6 }
  0x37   :  { %1863 = shalt.err (!%p1860_p10)
}
  0x38   :  { %81 = dma.hbm_to_vmem [thread:$0]  %s2210_s4, 512, %s76_s14, [#allocation9], %s1938_s18, %s1938_s18, %s1939_s19  }
  0x39   :  { %s1872_s2 = scalar_lea.vmem %s94_s16, 256  ;;  %p1877_p12 = scmp.lt.s32.totalorder %s94_s16, %s94_s16 }
  0x3a   :  { %p1873_p11 = scmp.ne.s32.totalorder %s94_s16, %s1872_s2  ;;  %p1878_p13 = scmp.lt.s32.totalorder %s1872_s2, %s1872_s2 }
  0x3c   :  { %p1879_p0 = por %p1878_p13, %p1877_p12 }
  0x3e   :  { %p1880_p1 = pnand %p1879_p0, %p1873_p11 }
  0x40   :  { %1883 = shalt.err (!%p1880_p1)
}
  0x41   :  { %99 = dma.hbm_to_vmem [thread:$0]  %s2214_s8, 256, %s94_s16, [#allocation12], %s1938_s18, %s1938_s18, %s1939_s19  }
  0x42   :  { %1924 = dma.done.wait [#allocation3], 256  }
  0x43   :  { %1925 = vsyncadd [#allocation3], 4294967040 }
  0x44   :  { %1926 = dma.done.wait [#allocation6], 768  }
  0x45   :  { %1927 = vsyncadd [#allocation6], 4294966528 }
  0x46   :  { %1928 = dma.done.wait [#allocation9], 1024  }
  0x47   :  { %1929 = vsyncadd [#allocation9], 4294966272 }
  0x48   :  { %1930 = dma.done.wait [#allocation12], 256  }
  0x49   :  { %1931 = vsyncadd [#allocation12], 4294967040  ;;  %v218_v0 = vld [vmem:[#allocation8 + $0x18] sm:$0xff]  ;;  %v217_v2 = vld [vmem:[#allocation8 + $0x10] sm:$0xff]  ;;  %vm131_vm0 = vcmask 261120   ;;  %vm335_vm1 = vcmask 64512  }
  0x4a   :  { %v123_v1 = vld [vmem:[#allocation7 + $0x18] sm:$0xff]  ;;  %1631 = vmatprep.subr.mxu1 %v218_v0  ;;  %v122_v3 = vld [vmem:[#allocation7 + $0x10] sm:$0xff]  ;;  %v216_v4 = vld [vmem:[#allocation8 + $0x8] sm:$0xff]  ;;  %s1944_s25 = smov 112   ;;  %s1945_s26 = smov 120   ;;  %vm686_vm2 = vcmask 130048  }
  0x4b   :  { %1620 = vmatprep.subr.mxu0 %v123_v1  ;;  %1632 = vmatpush3.msra.mxu1 %v218_v0  ;;  %v121_v5 = vld [vmem:[#allocation7 + $0x8] sm:$0xff]  ;;  %v215_v6 = vld [vmem:[#allocation8] sm:$0xff]  ;;  %v213_v7 = vld [vmem:[#allocation5] sm:$0xff]  ;;  %s1948_s27 = smov [#allocation14]  }
  0x4c   :  { %1621 = vmatpush3.msra.mxu0 %v123_v1  ;;  %1633 = vmatprep.subr.mxu1 %v217_v2  ;;  %v120_v8 = vld [vmem:[#allocation7] sm:$0xff]  ;;  %v214_v9 = vld [vmem:[#allocation5 + $0x8] sm:$0xff]  ;;  %v119_v11 = vld [vmem:[#allocation2 + $0x8] sm:$0xff]  ;;  %s1506_s28 = sshll.u32 %s1948_s27, 4  ;;  %s1507_s28 = int_to_ptr.vmem [resolvable:$true] %s1506_s28 }
  0x4d   :  { %1622 = vmatprep.subr.mxu0 %v122_v3  ;;  %1634 = vmatpush3.msra.mxu1 %v217_v2  ;;  %v118_v10 = vld [vmem:[#allocation2] sm:$0xff]  ;;  %v677_v35 = vld [vmem:[#allocation11 + $0x8] sm:$0xff]  ;;  %s1884_s1 = scalar_lea.vmem %s1507_s28, 1024  ;;  %p1889_p3 = scmp.lt.s32.totalorder %s1507_s28, %s1507_s28 }
  0x4e   :  { %1623 = vmatpush3.msra.mxu0 %v122_v3  ;;  %1635 = vmatprep.subr.mxu1 %v216_v4  ;;  %v1528_v12 = vld [vmem:[%s2212_s6] ss:$0 sm:$0xff]  ;;  %s1947_s6 = smov 96   ;;  %p1885_p2 = scmp.ne.s32.totalorder %s1507_s28, %s1884_s1 }
  0x4f   :  { %1624 = vmatprep.subr.mxu0 %v121_v5  ;;  %1636 = vmatpush3.msra.mxu1 %v216_v4  ;;  %v1525_v14 = vld [vmem:[%s2211_s5] ss:$0 sm:$0xff]  ;;  %s1946_s5 = smov 104   ;;  %p1890_p4 = scmp.lt.s32.totalorder %s1884_s1, %s1884_s1 }
  0x50   :  { %1625 = vmatpush3.msra.mxu0 %v121_v5  ;;  %1637 = vmatprep.subr.mxu1 %v215_v6  ;;  %v676_v38 = vld [vmem:[#allocation11] sm:$0xff] }
  0x51   :  { %1639 = vmatprep.mubr.msk.f32.mxu1 %vm131_vm0, %v213_v7  ;;  %1638 = vmatpush3.msra.mxu1 %v215_v6  ;;  %p1891_p5 = por %p1890_p4, %p1889_p3 }
  0x52   :  { %1626 = vmatprep.subr.mxu0 %v120_v8  ;;  %1640 = vmatmul.mubr.msk.f32.vlgmr.msra.gmra.mxu1 %vm131_vm0, %v214_v9 }
  0x53   :  { %1627 = vmatpush3.msra.mxu0 %v120_v8  ;;  %1628 = vmatprep.mubr.msk.f32.mxu0 %vm131_vm0, %v118_v10  ;;  %p1892_p6 = pnand %p1891_p5, %p1885_p2 }
  0x54   :  { %1629 = vmatmul.mubr.msk.f32.vlgmr.msra.gmra.mxu0 %vm131_vm0, %v119_v11 }
 0x112   :  { %v1641_v13 = vpop.f32.mrf.mxu1 }
 0x113   :  { %v2051_v15 = vadd.f32 %v1641_v13, %v1528_v12 }
 0x114   :  { %v1630_v16 = vpop.f32.mrf.mxu0  ;;  %v298_v17 = vpop.f32.mrf.mxu1 }
 0x115   :  { %v210_v18 = vadd.f32 %v1630_v16, %v1525_v14  ;;  %v2053_v19 = vadd.f32 %v1528_v12, %v298_v17  ;;  %329 = vrot.lane.b32.xlu1 %v2051_v15, %s1944_s25  ;;  %325 = vrot.lane.b32.xlu0 %v2051_v15, %s1945_s26 }
 0x116   :  { %1642 = vmatprep.subr.msk.mxu0 %vm335_vm1, %v2051_v15  ;;  %v204_v20 = vpop.f32.mrf.mxu0 }
 0x117   :  { %v205_v21 = vadd.f32 %v1525_v14, %v204_v20  ;;  %1643 = vmatpush3.xpose.msk.msra.mxu0 %vm335_vm1, %v2051_v15 }
 0x118   :  { %1644 = vmatprep.subr.msk.mxu0 %vm335_vm1, %v2053_v19 }
 0x119   :  { %333 = vrot.lane.b32.xlu0 %v2051_v15, %s1946_s5  ;;  %311 = vrot.lane.b32.xlu1 %v210_v18, %s1945_s26 }
 0x11a   :  { %1646 = vmatprep.mubr.msk.f32.mxu0 %vm335_vm1, %v205_v21 }
 0x11b   :  { %1645 = vmatpush3.xpose.msk.msra.mxu0 %vm335_vm1, %v2053_v19 }
 0x11d   :  { %323 = vrot.lane.b32.xlu0 %v2053_v19, %s1945_s26  ;;  %315 = vrot.lane.b32.xlu1 %v210_v18, %s1944_s25 }
 0x11e   :  { %1647 = vmatmul.mubr.msk.f32.vlgmr.msra.gmra.mxu0 %vm335_vm1, %v210_v18 }
 0x121   :  { %327 = vrot.lane.b32.xlu0 %v2053_v19, %s1944_s25  ;;  %309 = vrot.lane.b32.xlu1 %v205_v21, %s1945_s26 }
 0x125   :  { %313 = vrot.lane.b32.xlu0 %v205_v21, %s1944_s25  ;;  %331 = vrot.lane.b32.xlu1 %v2053_v19, %s1946_s5 }
 0x129   :  { %317 = vrot.lane.b32.xlu0 %v205_v21, %s1946_s5  ;;  %319 = vrot.lane.b32.xlu1 %v210_v18, %s1946_s5 }
 0x187   :  { %v2075_v22 = vpop.permute.xlu1 %329  ;;  %v2077_v23 = vpop.permute.xlu0 %325 }
 0x188   :  { %1649 = vmatprep.subr.msk.mxu1 %vm335_vm1, %v2077_v23  ;;  %1656 = vmatprep.subr.msk.mxu0 %vm335_vm1, %v2075_v22 }
 0x189   :  { %1650 = vmatpush3.xpose.msk.msra.mxu1 %vm335_vm1, %v2077_v23  ;;  %1657 = vmatpush3.xpose.msk.msra.mxu0 %vm335_vm1, %v2075_v22 }
 0x18b   :  { %v2087_v24 = vpop.permute.xlu0 %333  ;;  %v312_v25 = vpop.permute.xlu1 %311 }
 0x18f   :  { %v2089_v26 = vpop.permute.xlu0 %323  ;;  %v316_v27 = vpop.permute.xlu1 %315 }
 0x190   :  { %1651 = vmatprep.subr.msk.mxu1 %vm335_vm1, %v2089_v26 }
 0x191   :  { %1652 = vmatpush3.xpose.msk.msra.mxu1 %vm335_vm1, %v2089_v26 }
 0x192   :  { %1663 = vmatprep.subr.msk.mxu1 %vm335_vm1, %v2087_v24 }
 0x193   :  { %v2097_v28 = vpop.permute.xlu0 %327  ;;  %v310_v29 = vpop.permute.xlu1 %309 }
 0x194   :  { %1653 = vmatprep.mubr.msk.f32.mxu1 %vm335_vm1, %v310_v29  ;;  %1658 = vmatprep.subr.msk.mxu0 %vm335_vm1, %v2097_v28 }
 0x195   :  { %1654 = vmatmul.mubr.msk.f32.vlgmr.msra.gmra.mxu1 %vm335_vm1, %v312_v25  ;;  %1659 = vmatpush3.xpose.msk.msra.mxu0 %vm335_vm1, %v2097_v28 }
 0x196   :  { %1664 = vmatpush3.xpose.msk.msra.mxu1 %vm335_vm1, %v2087_v24 }
 0x197   :  { %v314_v30 = vpop.permute.xlu0 %313  ;;  %v2107_v31 = vpop.permute.xlu1 %331 }
 0x198   :  { %1660 = vmatprep.mubr.msk.f32.mxu0 %vm335_vm1, %v314_v30  ;;  %1665 = vmatprep.subr.msk.mxu1 %vm335_vm1, %v2107_v31 }
 0x199   :  { %1661 = vmatmul.mubr.msk.f32.vlgmr.msra.gmra.mxu0 %vm335_vm1, %v316_v27 }
 0x19a   :  { %1666 = vmatpush3.xpose.msk.msra.mxu1 %vm335_vm1, %v2107_v31 }
 0x19b   :  { %v318_v32 = vpop.permute.xlu0 %317  ;;  %v320_v33 = vpop.permute.xlu1 %319 }
 0x19c   :  { %1667 = vmatprep.mubr.msk.f32.mxu1 %vm335_vm1, %v318_v32 }
 0x19d   :  { %1668 = vmatmul.mubr.msk.f32.vlgmr.msra.gmra.mxu1 %vm335_vm1, %v320_v33 }
 0x1de   :  { %v1648_v34 = vpop.f32.mrf.mxu0 }
 0x1df   :  { %v669_v36 = vmul.f32 0.35355338, %v1648_v34 }
 0x1e0   :  { %v410_v37 = vpop.f32.mrf.mxu0 }
 0x1e1   :  { %v668_v39 = vmul.f32 0.35355338, %v410_v37  ;;  %v679_v40 = vadd.f32 %v677_v35, %v669_v36 }
 0x1e3   :  { %v690_v41 = vsel %vm686_vm2, %v679_v40, -inf  ;;  %v678_v42 = vadd.f32 %v676_v38, %v668_v39 }
 0x1e4   :  { %691 = vmax.xlane.f32.xlu1 %v690_v41 }
 0x1e5   :  { %v687_v43 = vsel %vm686_vm2, %v678_v42, -inf }
 0x1e6   :  { %688 = vmax.xlane.f32.xlu0 %v687_v43 }
 0x255   :  { %v1655_v44 = vpop.f32.mrf.mxu1 }
 0x256   :  { %v671_v45 = vmul.f32 0.35355338, %v1655_v44 }
 0x257   :  { %v493_v46 = vpop.f32.mrf.mxu1 }
 0x258   :  { %v670_v47 = vmul.f32 0.35355338, %v493_v46  ;;  %v681_v48 = vadd.f32 %v677_v35, %v671_v45 }
 0x259   :  { %v1662_v49 = vpop.f32.mrf.mxu0 }
 0x25a   :  { %v673_v50 = vmul.f32 0.35355338, %v1662_v49  ;;  %v696_v51 = vsel %vm686_vm2, %v681_v48, -inf  ;;  %v680_v52 = vadd.f32 %v676_v38, %v670_v47 }
 0x25b   :  { %697 = vmax.xlane.f32.xlu0 %v696_v51  ;;  %v576_v53 = vpop.f32.mrf.mxu0 }
 0x25c   :  { %v672_v54 = vmul.f32 0.35355338, %v576_v53  ;;  %v693_v57 = vsel %vm686_vm2, %v680_v52, -inf  ;;  %v683_v59 = vadd.f32 %v677_v35, %v673_v50 }
 0x25d   :  { %v1669_v55 = vpop.f32.mrf.mxu1 }
 0x25e   :  { %v675_v56 = vmul.f32 0.35355338, %v1669_v55  ;;  %v682_v58 = vadd.f32 %v676_v38, %v672_v54  ;;  %v702_v63 = vsel %vm686_vm2, %v683_v59, -inf }
 0x25f   :  { %v659_v60 = vpop.f32.mrf.mxu1  ;;  %694 = vmax.xlane.f32.xlu0 %v693_v57 }
 0x260   :  { %v674_v61 = vmul.f32 0.35355338, %v659_v60  ;;  %v699_v62 = vsel %vm686_vm2, %v682_v58, -inf  ;;  %v685_v1 = vadd.f32 %v677_v35, %v675_v56 }
 0x261   :  { %700 = vmax.xlane.f32.xlu1 %v699_v62 }
 0x262   :  { %v684_v0 = vadd.f32 %v676_v38, %v674_v61  ;;  %v708_v3 = vsel %vm686_vm2, %v685_v1, -inf }
 0x263   :  { %703 = vmax.xlane.f32.xlu0 %v702_v63 }
 0x264   :  { %v705_v2 = vsel %vm686_vm2, %v684_v0, -inf }
 0x265   :  { %706 = vmax.xlane.f32.xlu1 %v705_v2 }
 0x267   :  { %709 = vmax.xlane.f32.xlu0 %v708_v3 }
 0x26d   :  { %v692_v4 = vpop.xlane.xlu1 %691 }
 0x26e   :  { %v712_v5 = vsub.f32 %v679_v40, %v692_v4 }
 0x26f   :  { %v689_v6 = vpop.xlane.xlu0 %688 }
 0x270   :  { %v721_v7 = vmul.f32 1.442695, %v712_v5  ;;  %v711_v8 = vsub.f32 %v678_v42, %v689_v6 }
 0x272   :  { %1732 = vpow2.f32 %v721_v7  ;;  %v719_v9 = vmul.f32 1.442695, %v711_v8 }
 0x274   :  { %1734 = vpow2.f32 %v719_v9 }
 0x276   :  { %802 = vrot.lane.b32.xlu1 %v2051_v15, %s1947_s6 }
 0x27a   :  { %888 = vrot.lane.b32.xlu1 %v2077_v23, %s1947_s6 }
 0x27d   :  { %800 = vrot.lane.b32.xlu0 %v2053_v19, %s1947_s6 }
 0x27e   :  { %886 = vrot.lane.b32.xlu1 %v2089_v26, %s1947_s6 }
 0x27f   :  { %v2137_v10 = vpop.eup %1732 }
 0x280   :  { %v738_v11 = vsel %vm686_vm2, %v2137_v10, 0.0 }
 0x281   :  { %974 = vrot.lane.b32.xlu0 %v2075_v22, %s1947_s6  ;;  %v2141_v12 = vpop.eup %1734 }
 0x282   :  { %972 = vrot.lane.b32.xlu1 %v2097_v28, %s1947_s6  ;;  %v735_v13 = vsel %vm686_vm2, %v2141_v12, 0.0 }
 0x2a0   :  { %739 = vadd.xlane.f32.xlu0 %v738_v11 }
 0x2a6   :  { %736 = vadd.xlane.f32.xlu1 %v735_v13 }
 0x2e4   :  { %v698_v14 = vpop.xlane.xlu0 %697 }
 0x2e5   :  { %v714_v15 = vsub.f32 %v681_v48, %v698_v14  ;;  %v1145_v14 = vld [vmem:[#allocation10 + $0x8] sm:$0xff] }
 0x2e7   :  { %v725_v16 = vmul.f32 1.442695, %v714_v15  ;;  %v1146_v15 = vld [vmem:[#allocation10 + $0x10] sm:$0xff] }
 0x2e8   :  { %v695_v17 = vpop.xlane.xlu0 %694 }
 0x2e9   :  { %1736 = vpow2.f32 %v725_v16  ;;  %v713_v18 = vsub.f32 %v680_v52, %v695_v17  ;;  %v1147_v16 = vld [vmem:[#allocation10 + $0x18] sm:$0xff] }
 0x2ea   :  { %v701_v19 = vpop.xlane.xlu1 %700 }
 0x2eb   :  { %v723_v20 = vmul.f32 1.442695, %v713_v18  ;;  %v715_v21 = vsub.f32 %v682_v58, %v701_v19 }
 0x2ec   :  { %v704_v22 = vpop.xlane.xlu0 %703 }
 0x2ed   :  { %1738 = vpow2.f32 %v723_v20  ;;  %v727_v23 = vmul.f32 1.442695, %v715_v21  ;;  %v716_v25 = vsub.f32 %v683_v59, %v704_v22 }
 0x2ee   :  { %v707_v26 = vpop.xlane.xlu1 %706 }
 0x2ef   :  { %1740 = vpow2.f32 %v727_v23  ;;  %v729_v27 = vmul.f32 1.442695, %v716_v25  ;;  %v717_v28 = vsub.f32 %v684_v0, %v707_v26 }
 0x2f0   :  { %v710_v29 = vpop.xlane.xlu0 %709 }
 0x2f1   :  { %1742 = vpow2.f32 %v729_v27  ;;  %v731_v30 = vmul.f32 1.442695, %v717_v28  ;;  %v718_v32 = vsub.f32 %v685_v1, %v710_v29 }
 0x2f2   :  { %v803_v33 = vpop.permute.xlu1 %802 }
 0x2f3   :  { %1744 = vpow2.f32 %v731_v30  ;;  %v733_v34 = vmul.f32 1.442695, %v718_v32  ;;  %1670 = vmatprep.subr.mxu0 %v803_v33 }
 0x2f4   :  { %v801_v35 = vpop.permute.xlu0 %800  ;;  %1671 = vmatpush3.msra.mxu0 %v803_v33 }
 0x2f5   :  { %1746 = vpow2.f32 %v733_v34  ;;  %1672 = vmatprep.subr.mxu0 %v801_v35 }
 0x2f6   :  { %v1737_v36 = vpop.eup %1736  ;;  %1673 = vmatpush3.msra.mxu0 %v801_v35  ;;  %v889_v37 = vpop.permute.xlu1 %888 }
 0x2f7   :  { %1677 = vmatprep.subr.mxu1 %v889_v37  ;;  %v744_v38 = vsel %vm686_vm2, %v1737_v36, 0.0 }
 0x2f8   :  { %745 = vadd.xlane.f32.xlu0 %v744_v38  ;;  %v975_v39 = vpop.permute.xlu0 %974  ;;  %1678 = vmatpush3.msra.mxu1 %v889_v37 }
 0x2f9   :  { %1684 = vmatprep.subr.mxu0 %v975_v39 }
 0x2fa   :  { %v1739_v40 = vpop.eup %1738  ;;  %v887_v41 = vpop.permute.xlu1 %886 }
 0x2fb   :  { %1679 = vmatprep.subr.mxu1 %v887_v41  ;;  %v741_v42 = vsel %vm686_vm2, %v1739_v40, 0.0 }
 0x2fc   :  { %v1741_v43 = vpop.eup %1740  ;;  %742 = vadd.xlane.f32.xlu1 %v741_v42  ;;  %1680 = vmatpush3.msra.mxu1 %v887_v41 }
 0x2fd   :  { %v747_v46 = vsel %vm686_vm2, %v1741_v43, 0.0 }
 0x2fe   :  { %v1743_v44 = vpop.eup %1742  ;;  %v973_v52 = vpop.permute.xlu1 %972 }
 0x2ff   :  { %v750_v45 = vsel %vm686_vm2, %v1743_v44, 0.0 }
 0x300   :  { %v2149_v47 = vpop.eup %1744  ;;  %751 = vadd.xlane.f32.xlu0 %v750_v45  ;;  %748 = vadd.xlane.f32.xlu1 %v747_v46 }
 0x301   :  { %v753_v50 = vsel %vm686_vm2, %v2149_v47, 0.0 }
 0x302   :  { %v1747_v48 = vpop.eup %1746 }
 0x303   :  { %v756_v49 = vsel %vm686_vm2, %v1747_v48, 0.0 }
 0x304   :  { %757 = vadd.xlane.f32.xlu0 %v756_v49  ;;  %754 = vadd.xlane.f32.xlu1 %v753_v50 }
 0x315   :  { %1058 = vrot.lane.b32.xlu1 %v2107_v31, %s1947_s6  ;;  %v1144_v31 = vld [vmem:[#allocation10] sm:$0xff] }
 0x31a   :  { %1060 = vrot.lane.b32.xlu0 %v2087_v24, %s1947_s6 }
 0x329   :  { %v740_v51 = vpop.xlane.xlu0 %739 }
 0x32a   :  { %1748 = vrcp.f32 %v740_v51 }
 0x32f   :  { %v737_v53 = vpop.xlane.xlu1 %736 }
 0x330   :  { %1750 = vrcp.f32 %v737_v53 }
 0x337   :  { %v1749_v54 = vpop.eup %1748 }
 0x338   :  { %v762_v55 = vmul.f32 %v1749_v54, %v2137_v10 }
 0x33a   :  { %783 = vrot.lane.b32.xlu0 %v762_v55, %s1945_s26 }
 0x33d   :  { %v1751_v56 = vpop.eup %1750 }
 0x33e   :  { %v760_v57 = vmul.f32 %v1751_v56, %v2141_v12 }
 0x340   :  { %775 = vst.msk [vmem:[#allocation14] sm:$0xff] %vm335_vm1, %v760_v57  ;;  %1674 = vmatprep.mubr.msk.f32.mxu0 %vm686_vm2, %v760_v57 }
 0x341   :  { %1675 = vmatmul.mubr.msk.f32.vlgmr.msra.gmra.mxu0 %vm686_vm2, %v762_v55 }
 0x342   :  { %1685 = vmatpush3.msra.mxu0 %v975_v39 }
 0x343   :  { %1686 = vmatprep.subr.mxu0 %v973_v52 }
 0x344   :  { %1687 = vmatpush3.msra.mxu0 %v973_v52 }
 0x345   :  { %1698 = vmatprep.subr.mxu0 %v1144_v31 }
 0x381   :  { %v746_v24 = vpop.xlane.xlu0 %745 }
 0x382   :  { %1752 = vrcp.f32 %v746_v24 }
 0x385   :  { %v743_v58 = vpop.xlane.xlu1 %742 }
 0x386   :  { %1754 = vrcp.f32 %v743_v58 }
 0x389   :  { %v752_v59 = vpop.xlane.xlu0 %751  ;;  %v749_v60 = vpop.xlane.xlu1 %748 }
 0x38a   :  { %1756 = vrcp.f32 %v752_v59 }
 0x38b   :  { %1758 = vrcp.f32 %v749_v60 }
 0x38d   :  { %v758_v61 = vpop.xlane.xlu0 %757  ;;  %v755_v62 = vpop.xlane.xlu1 %754 }
 0x38e   :  { %1760 = vrcp.f32 %v758_v61 }
 0x38f   :  { %v1753_v63 = vpop.eup %1752  ;;  %1762 = vrcp.f32 %v755_v62 }
 0x390   :  { %v766_v0 = vmul.f32 %v1753_v63, %v1737_v36 }
 0x391   :  { %v1061_v1 = vpop.permute.xlu0 %1060  ;;  %v1059_v6 = vpop.permute.xlu1 %1058 }
 0x392   :  { %785 = vrot.lane.b32.xlu1 %v766_v0, %s1945_s26  ;;  %1691 = vmatprep.subr.mxu1 %v1061_v1 }
 0x393   :  { %v1755_v2 = vpop.eup %1754 }
 0x394   :  { %v764_v3 = vmul.f32 %v1755_v2, %v1739_v40 }
 0x396   :  { %776 = vst.msk [vmem:[#allocation14 + $0x8] sm:$0xff] %vm335_vm1, %v764_v3  ;;  %1681 = vmatprep.mubr.msk.f32.mxu1 %vm686_vm2, %v764_v3 }
 0x397   :  { %v1757_v4 = vpop.eup %1756  ;;  %1682 = vmatmul.mubr.msk.f32.vlgmr.msra.gmra.mxu1 %vm686_vm2, %v766_v0 }
 0x398   :  { %v1759_v5 = vpop.eup %1758  ;;  %1692 = vmatpush3.msra.mxu1 %v1061_v1  ;;  %v770_v7 = vmul.f32 %v1757_v4, %v1743_v44 }
 0x399   :  { %1693 = vmatprep.subr.mxu1 %v1059_v6  ;;  %v768_v8 = vmul.f32 %v1759_v5, %v1741_v43 }
 0x39a   :  { %1694 = vmatpush3.msra.mxu1 %v1059_v6  ;;  %787 = vrot.lane.b32.xlu0 %v770_v7, %s1945_s26 }
 0x39b   :  { %v1761_v9 = vpop.eup %1760  ;;  %777 = vst.msk [vmem:[#allocation14 + $0x10] sm:$0xff] %vm335_vm1, %v768_v8  ;;  %1688 = vmatprep.mubr.msk.f32.mxu0 %vm686_vm2, %v768_v8  ;;  %1703 = vmatprep.subr.mxu1 %v1145_v14 }
 0x39c   :  { %v1763_v10 = vpop.eup %1762  ;;  %1689 = vmatmul.mubr.msk.f32.vlgmr.msra.gmra.mxu0 %vm686_vm2, %v770_v7  ;;  %v774_v11 = vmul.f32 %v1761_v9, %v1747_v48 }
 0x39d   :  { %v772_v12 = vmul.f32 %v1763_v10, %v2149_v47  ;;  %1699 = vmatpush3.msra.mxu0 %v1144_v31 }
 0x39e   :  { %789 = vrot.lane.b32.xlu1 %v774_v11, %s1945_s26  ;;  %1708 = vmatprep.subr.mxu0 %v1146_v15 }
 0x39f   :  { %778 = vst.msk [vmem:[#allocation14 + $0x18] sm:$0xff] %vm335_vm1, %v772_v12  ;;  %1695 = vmatprep.mubr.msk.f32.mxu1 %vm686_vm2, %v772_v12 }
 0x3a0   :  { %1696 = vmatmul.mubr.msk.f32.vlgmr.msra.gmra.mxu1 %vm686_vm2, %v774_v11 }
 0x3a1   :  { %1704 = vmatpush3.msra.mxu1 %v1145_v14 }
 0x3a2   :  { %1713 = vmatprep.subr.mxu1 %v1147_v16 }
 0x3ac   :  { %v784_v13 = vpop.permute.xlu0 %783 }
 0x3ad   :  { %796 = vst.msk [vmem:[#allocation14 + $0x20] sm:$0xff] %vm335_vm1, %v784_v13 }
 0x401   :  { %v1676_v17 = vpop.f32.mrf.mxu0 }
 0x403   :  { %v877_v18 = vpop.f32.mrf.mxu0 }
 0x404   :  { %1700 = vmatprep.mubr.msk.f32.mxu0 %vm335_vm1, %v877_v18  ;;  %v786_v19 = vpop.permute.xlu1 %785 }
 0x405   :  { %797 = vst.msk [vmem:[#allocation14 + $0x28] sm:$0xff] %vm335_vm1, %v786_v19  ;;  %1701 = vmatmul.mubr.msk.f32.vlgmr.msra.gmra.mxu0 %vm335_vm1, %v1676_v17 }
 0x406   :  { %1709 = vmatpush3.msra.mxu0 %v1146_v15 }
 0x40c   :  { %v788_v20 = vpop.permute.xlu0 %787 }
 0x40d   :  { %798 = vst.msk [vmem:[#allocation14 + $0x30] sm:$0xff] %vm335_vm1, %v788_v20 }
 0x410   :  { %v790_v21 = vpop.permute.xlu1 %789 }
 0x411   :  { %799 = vst.msk [vmem:[#allocation14 + $0x38] sm:$0xff] %vm335_vm1, %v790_v21 }
 0x457   :  { %v1683_v22 = vpop.f32.mrf.mxu1 }
 0x459   :  { %v963_v23 = vpop.f32.mrf.mxu1 }
 0x45a   :  { %1705 = vmatprep.mubr.msk.f32.mxu1 %vm335_vm1, %v963_v23 }
 0x45b   :  { %1706 = vmatmul.mubr.msk.f32.vlgmr.msra.gmra.mxu1 %vm335_vm1, %v1683_v22 }
 0x45c   :  { %v1690_v25 = vpop.f32.mrf.mxu0  ;;  %1714 = vmatpush3.msra.mxu1 %v1147_v16 }
 0x45e   :  { %v1049_v26 = vpop.f32.mrf.mxu0 }
 0x45f   :  { %1710 = vmatprep.mubr.msk.f32.mxu0 %vm335_vm1, %v1049_v26 }
 0x460   :  { %v1697_v27 = vpop.f32.mrf.mxu1  ;;  %1711 = vmatmul.mubr.msk.f32.vlgmr.msra.gmra.mxu0 %vm335_vm1, %v1690_v25 }
 0x462   :  { %v1135_v28 = vpop.f32.mrf.mxu1 }
 0x463   :  { %1715 = vmatprep.mubr.msk.f32.mxu1 %vm335_vm1, %v1135_v28 }
 0x464   :  { %1716 = vmatmul.mubr.msk.f32.vlgmr.msra.gmra.mxu1 %vm335_vm1, %v1697_v27 }
 0x465   :  { %1895 = shalt.err (!%p1892_p6)
}
 0x466   :  { %1512 = dma.vmem_to_hbm [thread:$0]  %s1507_s28, 1024, %s2216_s10, [#allocation15], %s1938_s18, %s1938_s18, %s1939_s19  }
 0x467   :  { %v1563_v30 = vld [vmem:[%s2213_s7] ss:$0 sm:$0xff]  ;;  %s1949_s12 = smov [#allocation13]  }
 0x468   :  { %s1494_s13 = sshll.u32 %s1949_s12, 4  ;;  %s1495_s13 = int_to_ptr.vmem [resolvable:$true] %s1494_s13 }
 0x469   :  { %s1904_s7 = scalar_lea.vmem %s1495_s13, 256  ;;  %p1909_p8 = scmp.lt.s32.totalorder %s1495_s13, %s1495_s13 }
 0x46a   :  { %p1905_p7 = scmp.ne.s32.totalorder %s1495_s13, %s1904_s7  ;;  %p1910_p9 = scmp.lt.s32.totalorder %s1904_s7, %s1904_s7 }
 0x46c   :  { %p1911_p10 = por %p1910_p9, %p1909_p8 }
 0x46e   :  { %p1912_p11 = pnand %p1911_p10, %p1905_p7 }
 0x4c5   :  { %v1702_v29 = vpop.f32.mrf.mxu0 }
 0x4c6   :  { %v1480_v34 = vadd.f32 %v1702_v29, %v1563_v30 }
 0x4c7   :  { %v1220_v33 = vpop.f32.mrf.mxu0 }
 0x4c8   :  { %v1479_v37 = vadd.f32 %v1563_v30, %v1220_v33 }
 0x51b   :  { %v1707_v32 = vpop.f32.mrf.mxu1 }
 0x51c   :  { %v1482_v38 = vadd.f32 %v1707_v32, %v1480_v34 }
 0x51d   :  { %v1301_v35 = vpop.f32.mrf.mxu1 }
 0x51e   :  { %v1481_v40 = vadd.f32 %v1479_v37, %v1301_v35 }
 0x520   :  { %v1712_v36 = vpop.f32.mrf.mxu0 }
 0x521   :  { %v1484_v41 = vadd.f32 %v1712_v36, %v1482_v38 }
 0x522   :  { %v1382_v39 = vpop.f32.mrf.mxu0 }
 0x523   :  { %v1483_v43 = vadd.f32 %v1481_v40, %v1382_v39 }
 0x524   :  { %v1717_v42 = vpop.f32.mrf.mxu1 }
 0x525   :  { %v1486_v44 = vadd.f32 %v1717_v42, %v1484_v41 }
 0x526   :  { %v1463_v45 = vpop.f32.mrf.mxu1 }
 0x527   :  { %1488 = vst.msk [vmem:[#allocation13 + $0x8] sm:$0xff] %vm131_vm0, %v1486_v44  ;;  %v1485_v46 = vadd.f32 %v1483_v43, %v1463_v45 }
 0x529   :  { %1487 = vst.msk [vmem:[#allocation13] sm:$0xff] %vm131_vm0, %v1485_v46 }
 0x52a   :  { %1915 = shalt.err (!%p1912_p11)
}
 0x52b   :  { %1500 = dma.vmem_to_hbm [thread:$0]  %s1495_s13, 256, %s2215_s9, [#allocation4], %s1938_s18, %s1938_s18, %s1939_s19  }
 0x52c   :  { %1932 = dma.done.wait [#allocation4], 256  }
 0x52d   :  { %1933 = vsyncadd [#allocation4], 4294967040 }
 0x52e   :  { %1934 = dma.done.wait [#allocation15], 1024  }
 0x52f   :  { %1935 = vsyncadd [#allocation15], 4294966272 }
 0x530   :  { %1519 = vsyncpa [#allocation3], 1 }
 0x531   :  { %1520 = vsyncpa [#allocation6], 1 }
 0x532   :  { %1521 = vsyncpa [#allocation9], 1 }
 0x533   :  { %1522 = vsyncpa [#allocation12], 1 }
 0x534   :  { %1523 = vsyncpa [#allocation4], 1 }
 0x535   :  { %1524 = vsyncpa [#allocation15], 1 }

</bundles_post_ra>
